<compile_context>
chip_gen: v5e
topology: v5e:2x2
jax: 0.10.0
libtpu: 0.0.40
codegen_flags: <defaults>
</compile_context>

<pallas_src>
import jax
import jax.numpy as jnp
from jax.experimental import pallas as pl
from jax.experimental.pallas import tpu as pltpu

_LANES = 128
_MAX_TILE_ROWS = 2048  # 2048 * 128 * 4B = 1 MiB per input buffer


def _pad_to(x, n, value):
    """Pad a 1-D array to length n with `value` (no-op when already length n)."""
    pad = n - x.shape[0]
    if pad == 0:
        return x
    return jnp.concatenate([x, jnp.full((pad,), value, x.dtype)])


def discriminator_loss(Sr, Sw, Sf, *, max_tile_rows=_MAX_TILE_ROWS):
    """BCE(Sr, 1) + 0.5 * (BCE(Sw, 0) + BCE(Sf, 0)), mean reduction."""
    assert Sr.shape == Sw.shape == Sf.shape and Sr.ndim == 1
    B = Sr.shape[0]

    rows = -(-B // _LANES)  # cdiv
    if rows <= max_tile_rows:
        tile_rows = rows            # single grid step, block == full array
        rows_p = rows
    else:
        tile_rows = max_tile_rows   # multiple of 8 by construction
        rows_p = -(-rows // tile_rows) * tile_rows

    total_p = rows_p * _LANES
    # Padding values contribute exactly 0 to the weighted log-sum:
    #   real branch:  log(1.0)       = 0
    #   fake branch:  log(1 - 0.0)   = 0
    sr = _pad_to(Sr, total_p, 1.0).reshape(rows_p, _LANES)
    sw = _pad_to(Sw, total_p, 0.0).reshape(rows_p, _LANES)
    sf = _pad_to(Sf, total_p, 0.0).reshape(rows_p, _LANES)

    grid = (rows_p // tile_rows,)
    inv_b = 1.0 / float(B)
    rows_mult8 = (tile_rows % 8 == 0)  # multi-step tiles are always mult-of-8

    def kernel(sr_ref, sw_ref, sf_ref, out_ref, acc_ref):
        i = pl.program_id(0)

        @pl.when(i == 0)
        def _():
            acc_ref[...] = jnp.zeros_like(acc_ref)

        # In-kernel cast (f32 math for log on all generations; inputs may be bf16).
        x_r = sr_ref[...].astype(jnp.float32)
        x_w = sw_ref[...].astype(jnp.float32)
        x_f = sf_ref[...].astype(jnp.float32)

        # PyTorch nn.BCELoss clamps each log term at -100.
        term = (jnp.maximum(jnp.log(x_r), -100.0)
                + 0.5 * (jnp.maximum(jnp.log(1.0 - x_w), -100.0)
                         + jnp.maximum(jnp.log(1.0 - x_f), -100.0)))

        if rows_mult8:
            # Pure-VALU partial: fold sublane groups into the (8,128) accumulator.
            acc_ref[...] += term.reshape(tile_rows // 8, 8, _LANES).sum(axis=0)
        else:
            # Only reachable for a single-step ragged tile (rows < multiple of 8).
            acc_ref[0:1, :] += jnp.sum(term, axis=0, keepdims=True)

        @pl.when(i == pl.num_programs(0) - 1)
        def _():
            # One cross-lane/sublane reduce + one 1/B scale, then scalar SMEM store.
            out_ref[0] = -jnp.sum(acc_ref[...]) * inv_b

    spec = pl.BlockSpec((tile_rows, _LANES), lambda i: (i, 0))
    out = pl.pallas_call(
        kernel,
        out_shape=jax.ShapeDtypeStruct((1,), jnp.float32),
        grid=grid,
        in_specs=[spec, spec, spec],
        out_specs=pl.BlockSpec(memory_space=pltpu.MemorySpace.SMEM),
        scratch_shapes=[pltpu.VMEM((8, _LANES), jnp.float32)],
        compiler_params=pltpu.CompilerParams(
            dimension_semantics=("arbitrary",)),  # sequential reduction axis
    )(sr, sw, sf)
    return out[0]


def _reference(Sr, Sw, Sf):
    def bce(x, y):
        lx = jnp.maximum(jnp.log(x), -100.0)
        l1mx = jnp.maximum(jnp.log(1.0 - x), -100.0)
        return jnp.mean(-(y * lx + (1.0 - y) * l1mx))

    ones = jnp.ones(Sr.shape[0], jnp.float32)
    zeros = jnp.zeros(Sr.shape[0], jnp.float32)
    return bce(Sr, ones) + 0.5 * (bce(Sw, zeros) + bce(Sf, zeros))


if __name__ == "__main__":
    # 1) Small ragged batch (B=8): pad-to-one-row path, single grid step.
    k1, k2, k3 = jax.random.split(jax.random.PRNGKey(0), 3)
    B = 8
    Sr = jax.random.uniform(k1, (B,), jnp.float32, minval=0.05, maxval=0.95)
    Sw = jax.random.uniform(k2, (B,), jnp.float32, minval=0.05, maxval=0.95)
    Sf = jax.random.uniform(k3, (B,), jnp.float32, minval=0.05, maxval=0.95)

    loss = discriminator_loss(Sr, Sw, Sf)
    jax.block_until_ready(loss)
    ref = _reference(Sr, Sw, Sf)
    assert jnp.allclose(loss, ref, rtol=1e-5, atol=1e-5), (loss, ref)

    # 2) Lane-aligned batch (B=2048): copy-free reshape fast path, 1 grid step.
    k4, k5, k6 = jax.random.split(jax.random.PRNGKey(1), 3)
    B2 = 2048
    Sr2 = jax.random.uniform(k4, (B2,), jnp.float32, minval=0.01, maxval=0.99)
    Sw2 = jax.random.uniform(k5, (B2,), jnp.float32, minval=0.01, maxval=0.99)
    Sf2 = jax.random.uniform(k6, (B2,), jnp.float32, minval=0.01, maxval=0.99)

    loss2 = discriminator_loss(Sr2, Sw2, Sf2)
    jax.block_until_ready(loss2)
    ref2 = _reference(Sr2, Sw2, Sf2)
    assert jnp.allclose(loss2, ref2, rtol=1e-4, atol=1e-4), (loss2, ref2)

    # 3) Same data with a tiny tile to exercise the multi-grid-step
    #    accumulator (init / accumulate / finalize) path.
    loss3 = discriminator_loss(Sr2, Sw2, Sf2, max_tile_rows=8)
    jax.block_until_ready(loss3)
    assert jnp.allclose(loss3, ref2, rtol=1e-4, atol=1e-4), (loss3, ref2)

    print("KERNEL_OK")
</pallas_src>

<mosaic_0001>
module attributes {stable_mosaic.version = 11 : i64} {
  func.func @kernel(%arg0: i32, %arg1: memref<1x128xf32, #tpu.memory_space<vmem>>, %arg2: memref<1x128xf32, #tpu.memory_space<vmem>>, %arg3: memref<1x128xf32, #tpu.memory_space<vmem>>, %arg4: memref<1xf32, #tpu.memory_space<smem>>, %arg5: memref<8x128xf32, #tpu.memory_space<vmem>>) attributes {dimension_semantics = [#tpu.dimension_semantics<arbitrary>], iteration_bounds = array<i64: 1>, scalar_prefetch = 0 : i64, scratch_operands = 1 : i64, tpu.core_type = #tpu.core_type<tc>, window_params = [{transform_indices = @transform_0, window_bounds = array<i64: 1, 128>}, {transform_indices = @transform_1, window_bounds = array<i64: 1, 128>}, {transform_indices = @transform_2, window_bounds = array<i64: 1, 128>}, {transform_indices = @transform_3, window_bounds = array<i64: 1>}]} {
    %c0_i32 = arith.constant 0 : i32
    %0 = arith.cmpi eq, %arg0, %c0_i32 : i32
    %1 = arith.extui %0 : i1 to i32
    %c0_i32_0 = arith.constant 0 : i32
    %2 = arith.cmpi ne, %1, %c0_i32_0 : i32
    scf.if %2 {
      %cst_18 = arith.constant 0.000000e+00 : f32
      %31 = vector.broadcast %cst_18 : f32 to vector<8x128xf32>
      %c0_19 = arith.constant 0 : index
      %c0_20 = arith.constant 0 : index
      %32 = vector.load %arg5[%c0_19, %c0_20] : memref<8x128xf32, #tpu.memory_space<vmem>>, vector<8x128xf32>
      tpu.vector_store %arg5[%c0_19, %c0_20], %31 {strides = array<i32>} : memref<8x128xf32, #tpu.memory_space<vmem>>, vector<8x128xf32>,
    } else {
    }
    %c0 = arith.constant 0 : index
    %c0_1 = arith.constant 0 : index
    %3 = vector.load %arg1[%c0, %c0_1] : memref<1x128xf32, #tpu.memory_space<vmem>>, vector<1x128xf32>
    %c0_2 = arith.constant 0 : index
    %c0_3 = arith.constant 0 : index
    %4 = vector.load %arg2[%c0_2, %c0_3] : memref<1x128xf32, #tpu.memory_space<vmem>>, vector<1x128xf32>
    %c0_4 = arith.constant 0 : index
    %c0_5 = arith.constant 0 : index
    %5 = vector.load %arg3[%c0_4, %c0_5] : memref<1x128xf32, #tpu.memory_space<vmem>>, vector<1x128xf32>
    %6 = math.log %3 : vector<1x128xf32>
    %cst = arith.constant -1.000000e+02 : f32
    %7 = vector.broadcast %cst : f32 to vector<1x128xf32>
    %8 = arith.maximumf %6, %7 : vector<1x128xf32>
    %cst_6 = arith.constant 1.000000e+00 : f32
    %9 = vector.broadcast %cst_6 : f32 to vector<1x128xf32>
    %10 = arith.subf %9, %4 : vector<1x128xf32>
    %11 = math.log %10 : vector<1x128xf32>
    %cst_7 = arith.constant -1.000000e+02 : f32
    %12 = vector.broadcast %cst_7 : f32 to vector<1x128xf32>
    %13 = arith.maximumf %11, %12 : vector<1x128xf32>
    %cst_8 = arith.constant 1.000000e+00 : f32
    %14 = vector.broadcast %cst_8 : f32 to vector<1x128xf32>
    %15 = arith.subf %14, %5 : vector<1x128xf32>
    %16 = math.log %15 : vector<1x128xf32>
    %cst_9 = arith.constant -1.000000e+02 : f32
    %17 = vector.broadcast %cst_9 : f32 to vector<1x128xf32>
    %18 = arith.maximumf %16, %17 : vector<1x128xf32>
    %19 = arith.addf %13, %18 : vector<1x128xf32>
    %cst_10 = arith.constant 5.000000e-01 : f32
    %20 = vector.broadcast %cst_10 : f32 to vector<1x128xf32>
    %21 = arith.mulf %20, %19 : vector<1x128xf32>
    %22 = arith.addf %8, %21 : vector<1x128xf32>
    %c0_11 = arith.constant 0 : index
    %c0_12 = arith.constant 0 : index
    %23 = vector.load %arg5[%c0_11, %c0_12] : memref<8x128xf32, #tpu.memory_space<vmem>>, vector<1x128xf32>
    %cst_13 = arith.constant dense<0.000000e+00> : vector<128xf32>
    %24 = vector.multi_reduction <add>, %22, %cst_13 [0] : vector<1x128xf32> to vector<128xf32>
    %25 = vector.shape_cast %24 : vector<128xf32> to vector<1x128xf32>
    %26 = arith.addf %23, %25 : vector<1x128xf32>
    %c0_14 = arith.constant 0 : index
    %c0_15 = arith.constant 0 : index
    %27 = vector.load %arg5[%c0_14, %c0_15] : memref<8x128xf32, #tpu.memory_space<vmem>>, vector<1x128xf32>
    tpu.vector_store %arg5[%c0_14, %c0_15], %26 {strides = array<i32>} : memref<8x128xf32, #tpu.memory_space<vmem>>, vector<1x128xf32>,
    %c0_i32_16 = arith.constant 0 : i32
    %28 = arith.cmpi eq, %arg0, %c0_i32_16 : i32
    %29 = arith.extui %28 : i1 to i32
    %c0_i32_17 = arith.constant 0 : i32
    %30 = arith.cmpi ne, %29, %c0_i32_17 : i32
    scf.if %30 {
      %c0_18 = arith.constant 0 : index
      %c0_19 = arith.constant 0 : index
      %31 = vector.load %arg5[%c0_18, %c0_19] : memref<8x128xf32, #tpu.memory_space<vmem>>, vector<8x128xf32>
      %32 = vector.shape_cast %31 : vector<8x128xf32> to vector<1x8x128xf32>
      %cst_20 = arith.constant dense<0.000000e+00> : vector<1xf32>
      %33 = vector.multi_reduction <add>, %32, %cst_20 [1, 2] : vector<1x8x128xf32> to vector<1xf32>
      %34 = vector.shape_cast %33 : vector<1xf32> to vector<1x1x1xf32>
      %35 = vector.extract %34[0, 0, 0] : f32 from vector<1x1x1xf32>
      %cst_21 = arith.constant 0.000000e+00 : f32
      %36 = arith.subf %cst_21, %35 : f32
      %cst_22 = arith.constant 1.250000e-01 : f32
      %37 = arith.mulf %36, %cst_22 : f32
      %c0_23 = arith.constant 0 : index
      %38 = memref.load %arg4[%c0_23] : memref<1xf32, #tpu.memory_space<smem>>
      memref.store %37, %arg4[%c0_23] : memref<1xf32, #tpu.memory_space<smem>>
    } else {
    }
    return
  }
  func.func @transform_0(%arg0: i32) -> (i32, i32) {
    %c0_i32 = arith.constant 0 : i32
    %c0_i32_0 = arith.constant 0 : i32
    return %arg0, %c0_i32 : i32, i32
  }
  func.func @transform_1(%arg0: i32) -> (i32, i32) {
    %c0_i32 = arith.constant 0 : i32
    %c0_i32_0 = arith.constant 0 : i32
    return %arg0, %c0_i32 : i32, i32
  }
  func.func @transform_2(%arg0: i32) -> (i32, i32) {
    %c0_i32 = arith.constant 0 : i32
    %c0_i32_0 = arith.constant 0 : i32
    return %arg0, %c0_i32 : i32, i32
  }
  func.func @transform_3(%arg0: i32) -> i32 {
    %c0_i32 = arith.constant 0 : i32
    %c0_i32_0 = arith.constant 0 : i32
    return %c0_i32 : i32
  }
}

</mosaic_0001>

<bundles_post_ra>
// kernel: tpu_custom_call.1
= control target key start
LH: loop header
LB: loop body
LE: loop exit
PB: predicated region body
PF: predicated region fallthrough
CT: control target
= control target key end

     0   :  { %8 = vsyncpa [#allocation4], 0  ;;  %s217_s0 = inlined_call_operand.hbm [shape: f32[1,128], index: 0, kind: input, shape index: {}]   ;;  %s218_s1 = inlined_call_operand.hbm [shape: f32[1,128], index: 1, kind: input, shape index: {}]   ;;  %s219_s2 = inlined_call_operand.vmem [shape: f32[1,128], index: 2, kind: input, shape index: {}]   ;;  %s220_s3 = inlined_call_operand.hbm [shape: f32[1], index: 3, kind: output, shape index: {}]  }
   0x1   :  { %9 = vsyncpa [#allocation7], 0 }
   0x2   :  { %10 = vsyncpa [#allocation5], 0  ;;  %s16_s14 = sshll.u32 %s217_s0, 4  ;;  %s181_s15 = smov [#allocation3]   ;;  %s17_s14 = int_to_ptr.hbm [resolvable:$true] %s16_s14 }
   0x3   :  { %s18_s16 = sshll.u32 %s181_s15, 4  ;;  %s27_s19 = sshll.u32 %s218_s1, 4  ;;  %s19_s16 = int_to_ptr.vmem [resolvable:$true] %s18_s16  ;;  %s28_s19 = int_to_ptr.hbm [resolvable:$true] %s27_s19 }
   0x4   :  { %21 = dma.hbm_to_vmem [thread:$0]  %s17_s14, 16, %s19_s16, [#allocation4]  }
   0x5   :  { %s182_s20 = smov [#allocation6]  }
   0x6   :  { %s29_s21 = sshll.u32 %s182_s20, 4  ;;  %s30_s21 = int_to_ptr.vmem [resolvable:$true] %s29_s21 }
   0x7   :  { %32 = dma.hbm_to_vmem [thread:$0]  %s28_s19, 16, %s30_s21, [#allocation7]  }
   0x8   :  { %175 = dma.done.wait [#allocation4], 16  }
   0x9   :  { %176 = vsyncadd [#allocation4], 4294967280 }
   0xa   :  { %177 = dma.done.wait [#allocation7], 16  }
   0xb   :  { %178 = vsyncadd [#allocation7], 4294967280  ;;  %v183_v0 = vmov 0.0   ;;  %v48_v1 = vld [vmem:[#allocation3] sm:$0x1]  ;;  %s91_s23 = sshll.u32 %s220_s3, 4  ;;  %s92_s23 = int_to_ptr.hbm [resolvable:$true] %s91_s23 }
   0xc   :  { %47 = vst [vmem:[#allocation2] sm:$0xff] %v183_v0  ;;  %v49_v2 = vld [vmem:[#allocation6] sm:$0x1]  ;;  %v50_v3 = vld [vmem:[%s219_s2] sm:$0x1]  ;;  %109 = vlog2.f32 %v48_v1  ;;  %s184_s27 = smov [#allocation8]  }
   0xd   :  { %v54_v4 = vsub.f32 1.0, %v49_v2  ;;  %v58_v5 = vsub.f32 1.0, %v50_v3 }
   0xf   :  { %111 = vlog2.f32 %v54_v4 }
  0x10   :  { %113 = vlog2.f32 %v58_v5 }
  0x12   :  { %v110_v6 = vpop.eup %109 }
  0x13   :  { %v52_v10 = vmul.f32 0.6931472, %v110_v6  ;;  %v65_v17 = vld [vmem:[#allocation2] sm:$0x1] }
  0x15   :  { %v112_v7 = vpop.eup %111  ;;  %v53_v14 = vmax.f32 %v52_v10, -100.0 }
  0x16   :  { %v114_v8 = vpop.eup %113  ;;  %v56_v9 = vmul.f32 0.6931472, %v112_v7 }
  0x17   :  { %v60_v11 = vmul.f32 0.6931472, %v114_v8 }
  0x18   :  { %v57_v12 = vmax.f32 %v56_v9, -100.0 }
  0x19   :  { %v61_v13 = vmax.f32 %v60_v11, -100.0 }
  0x1b   :  { %v62_v15 = vadd.f32 %v61_v13, %v57_v12 }
  0x1d   :  { %v63_v16 = vmul.f32 0.5, %v62_v15 }
  0x1f   :  { %v64_v18 = vadd.f32 %v63_v16, %v53_v14 }
  0x21   :  { %v67_v19 = vadd.f32 %v65_v17, %v64_v18 }
  0x23   :  { %68 = vst [vmem:[#allocation2] sm:$0x1] %v67_v19 }
  0x2a   :  { %v72_v20 = vld [vmem:[#allocation2] sm:$0xff] }
  0x2b   :  { %73 = vadd.xlane.f32.xlu0 %v72_v20 }
  0x9e   :  { %v74_v21 = vpop.xlane.xlu0 %73 }
  0x9f   :  { %v75_v22 = vrot.slane %v74_v21, 4 }
  0xa1   :  { %v76_v23 = vadd.f32 %v75_v22, %v74_v21 }
  0xa3   :  { %v77_v24 = vrot.slane %v76_v23, 2 }
  0xa5   :  { %v78_v25 = vadd.f32 %v77_v24, %v76_v23 }
  0xa7   :  { %v79_v26 = vrot.slane %v78_v25, 1 }
  0xa9   :  { %v80_v27 = vadd.f32 %v79_v26, %v78_v25 }
  0xab   :  { %103 = vpush %v80_v27 }
  0xdc   :  { %s104_s24 = spop %103 }
  0xdd   :  { %s82_s25 = ssub.f32 0.0, %s104_s24 }
  0xdf   :  { %s83_s26 = smul.f32 0.125, %s82_s25 }
  0xe1   :  { %85 = sst [smem:[#allocation8]] %s83_s26 }
  0xe2   :  { %94 = dma.smem_to_hbm %s184_s27, 16, %s92_s23, [#allocation5]  }
  0xe3   :  { %179 = dma.done.wait [#allocation5], 16  }
  0xe4   :  { %180 = vsyncadd [#allocation5], 4294967280 }
  0xe5   :  { %99 = sfence }
  0xe6   :  { %100 = vsyncpa [#allocation4], 1 }
  0xe7   :  { %101 = vsyncpa [#allocation7], 1 }
  0xe8   :  { %102 = vsyncpa [#allocation5], 1 }

</bundles_post_ra>
